<compile_context>
chip_gen: v7x
topology: tpu7x:2x2x1
jax: 0.10.0
libtpu: 0.0.40
codegen_flags: <defaults>
</compile_context>

<pallas_src>
import jax
import jax.numpy as jnp
from jax import lax
from jax.experimental import pallas as pl
from jax.experimental.pallas import tpu as pltpu

# ----- small config consistent with the module -----
CFG = dict(
    vocab_size=256,
    context_length=16,
    emb_dim=128,
    n_layers=2,       # DummyTransformerBlock == identity
    drop_rate=0.1,    # dropout applied in eval mode == identity
)
BATCH = 2
SEQ = 8


def _gpt_kernel(ids_ref, tok_ref, pos_ref, w_ref, out_ref):
    """Single invocation over the whole (B*S) token block.

    ids_ref : VMEM (B*S, 1) int32   flattened token ids
    tok_ref : VMEM (V, E)   bf16    token embedding table
    pos_ref : VMEM (S, E)   bf16    positional embedding table (first S rows)
    w_ref   : VMEM (V, E)   bf16    out_head weight (Linear E->V, bias=False)
    out_ref : VMEM (B*S, V) f32     logits
    """
    n_rows, vocab = out_ref.shape
    seq = pos_ref.shape[0]
    batch = n_rows // seq

    # --- token embedding gather, vectorized as a one-hot MXU matmul ---------
    # Exact: each output row has exactly one nonzero product; f32 accumulate.
    ids = ids_ref[...]                                             # (B*S, 1) i32
    lanes = lax.broadcasted_iota(jnp.int32, (n_rows, vocab), 1)    # (B*S, V)
    onehot = (lanes == ids).astype(jnp.bfloat16)                   # (B*S, V)
    tok = lax.dot_general(
        onehot, tok_ref[...],
        dimension_numbers=(((1,), (0,)), ((), ())),
        preferred_element_type=jnp.float32,
    )                                                              # (B*S, E) f32

    # --- positional add (broadcast over batch), kept in f32 on the VPU ------
    pos = pos_ref[...].astype(jnp.float32)                         # (S, E)
    x = tok + jnp.concatenate([pos] * batch, axis=0)               # (B*S, E)

    # drop_emb / trf_blocks / final_norm are identities in the dummy model.

    # --- output projection: x @ W.T, no host-side transpose -----------------
    out_ref[...] = lax.dot_general(
        x.astype(jnp.bfloat16), w_ref[...],
        dimension_numbers=(((1,), (1,)), ((), ())),                # contract E
        preferred_element_type=jnp.float32,
    )                                                              # (B*S, V)


def dummy_gpt_forward(in_idx, tok_table, pos_table, out_head_w):
    """in_idx: (B, S) int32; bf16 tables/weights. Returns (B, S, V) f32 logits."""
    B, S = in_idx.shape
    V, E = tok_table.shape

    ids_flat = in_idx.reshape(B * S, 1).astype(jnp.int32)

    vmem = pl.BlockSpec(memory_space=pltpu.MemorySpace.VMEM)
    logits_flat = pl.pallas_call(
        _gpt_kernel,
        out_shape=jax.ShapeDtypeStruct((B * S, V), jnp.float32),
        in_specs=[vmem, vmem, vmem, vmem],
        out_specs=vmem,
    )(ids_flat, tok_table, pos_table[:S], out_head_w)

    # Free metadata reshape back to the PyTorch (batch, seq, vocab) layout.
    return logits_flat.reshape(B, S, V)


if __name__ == "__main__":
    key = jax.random.PRNGKey(0)
    k_ids, k_tok, k_pos, k_w = jax.random.split(key, 4)

    V, E, C = CFG["vocab_size"], CFG["emb_dim"], CFG["context_length"]

    # Deterministic synthetic parameters, stored as bf16 (halves DMA bytes).
    tok_table = (jax.random.normal(k_tok, (V, E), jnp.float32) * 0.02).astype(jnp.bfloat16)
    pos_table = (jax.random.normal(k_pos, (C, E), jnp.float32) * 0.02).astype(jnp.bfloat16)
    out_head_w = (jax.random.normal(k_w, (V, E), jnp.float32) * 0.02).astype(jnp.bfloat16)

    in_idx = jax.random.randint(k_ids, (BATCH, SEQ), 0, V, dtype=jnp.int32)

    logits = dummy_gpt_forward(in_idx, tok_table, pos_table, out_head_w)
    logits = jax.block_until_ready(logits)

    # Pure-JAX reference mirroring the kernel numerics (bf16 params, f32 math).
    tok_f32 = tok_table.astype(jnp.float32)
    pos_f32 = pos_table.astype(jnp.float32)
    w_f32 = out_head_w.astype(jnp.float32)
    x_ref = tok_f32[in_idx] + pos_f32[:SEQ][None, :, :]
    x_ref = x_ref.astype(jnp.bfloat16).astype(jnp.float32)
    logits_ref = jnp.einsum("bse,ve->bsv", x_ref, w_f32)

    assert logits.shape == (BATCH, SEQ, V)
    assert jnp.allclose(logits, logits_ref, atol=1e-3, rtol=1e-3), (
        float(jnp.max(jnp.abs(logits - logits_ref))))

    print("KERNEL_OK")
</pallas_src>

<mosaic_0001>
module attributes {stable_mosaic.version = 11 : i64} {
  func.func @_gpt_kernel(%arg0: memref<16x1xi32, #tpu.memory_space<vmem>>, %arg1: memref<256x128xbf16, #tpu.memory_space<vmem>>, %arg2: memref<8x128xbf16, #tpu.memory_space<vmem>>, %arg3: memref<256x128xbf16, #tpu.memory_space<vmem>>, %arg4: memref<16x256xf32, #tpu.memory_space<vmem>>) attributes {dimension_semantics = [], scalar_prefetch = 0 : i64, scratch_operands = 0 : i64, tpu.core_type = #tpu.core_type<tc>} {
    %c0 = arith.constant 0 : index
    %c0_0 = arith.constant 0 : index
    %0 = vector.load %arg0[%c0, %c0_0] : memref<16x1xi32, #tpu.memory_space<vmem>>, vector<16x1xi32>
    %1 = tpu.iota {dimensions = array<i32: 1>} : vector<16x256xi32>
    %2 = vector.broadcast %0 : vector<16x1xi32> to vector<16x256xi32>
    %3 = arith.cmpi eq, %1, %2 : vector<16x256xi32>
    %4 = arith.extui %3 : vector<16x256xi1> to vector<16x256xi32>
    %5 = arith.sitofp %4 : vector<16x256xi32> to vector<16x256xf32>
    %6 = arith.truncf %5 : vector<16x256xf32> to vector<16x256xbf16>
    %c0_1 = arith.constant 0 : index
    %c0_2 = arith.constant 0 : index
    %7 = vector.load %arg1[%c0_1, %c0_2] : memref<256x128xbf16, #tpu.memory_space<vmem>>, vector<256x128xbf16>
    %cst = arith.constant dense<0.000000e+00> : vector<16x128xf32>
    %8 = tpu.matmul %6, %7, %cst {dimension_numbers = #tpu.dot_dimension_numbers<[1], [0], [0], [1], [0, 0, 1, 1], [], []>} : vector<16x256xbf16>, vector<256x128xbf16>, vector<16x128xf32> -> vector<16x128xf32>
    %c0_3 = arith.constant 0 : index
    %c0_4 = arith.constant 0 : index
    %9 = vector.load %arg2[%c0_3, %c0_4] : memref<8x128xbf16, #tpu.memory_space<vmem>>, vector<8x128xbf16>
    %10 = arith.extf %9 : vector<8x128xbf16> to vector<8x128xf32>
    %11 = tpu.concatenate %10, %10 in 0 : vector<8x128xf32>, vector<8x128xf32> -> vector<16x128xf32>
    %12 = arith.addf %8, %11 : vector<16x128xf32>
    %13 = arith.truncf %12 : vector<16x128xf32> to vector<16x128xbf16>
    %c0_5 = arith.constant 0 : index
    %c0_6 = arith.constant 0 : index
    %14 = vector.load %arg3[%c0_5, %c0_6] : memref<256x128xbf16, #tpu.memory_space<vmem>>, vector<256x128xbf16>
    %cst_7 = arith.constant dense<0.000000e+00> : vector<16x256xf32>
    %15 = tpu.matmul %13, %14, %cst_7 {dimension_numbers = #tpu.dot_dimension_numbers<[1], [1], [0], [0], [0, 0, 1, 0], [], []>} : vector<16x128xbf16>, vector<256x128xbf16>, vector<16x256xf32> -> vector<16x256xf32>
    %c0_8 = arith.constant 0 : index
    %c0_9 = arith.constant 0 : index
    %16 = vector.load %arg4[%c0_8, %c0_9] : memref<16x256xf32, #tpu.memory_space<vmem>>, vector<16x256xf32>
    tpu.vector_store %arg4[%c0_8, %c0_9], %15 {strides = array<i32>} : memref<16x256xf32, #tpu.memory_space<vmem>>, vector<16x256xf32>,
    return
  }
}

</mosaic_0001>

<bundles_post_ra>
// kernel: tpu_custom_call.1
= control target key start
LH: loop header
LB: loop body
LE: loop exit
PB: predicated region body
PF: predicated region fallthrough
CT: control target
= control target key end

     0   :  { %9 = vsyncpa [#allocation3], 0  ;;  %s710_s0 = inlined_call_operand.vmem [shape: s32[16,1], index: 0, kind: input, shape index: {}]   ;;  %s711_s1 = inlined_call_operand.hbm [shape: bf16[256,128], index: 1, kind: input, shape index: {}]   ;;  %s712_s2 = inlined_call_operand.vmem [shape: bf16[8,128], index: 2, kind: input, shape index: {}]   ;;  %s713_s3 = inlined_call_operand.hbm [shape: bf16[256,128], index: 3, kind: input, shape index: {}]   ;;  %s714_s4 = inlined_call_operand.hbm [shape: f32[16,256], index: 4, kind: output, shape index: {}]  }
   0x1   :  { %10 = vsyncpa [#allocation6], 0 }
   0x2   :  { %11 = vsyncpa [#allocation4], 0  ;;  %s631_s15 = smov [#allocation2]   ;;  %s559_s19 = scalar_lea.hbm %s711_s1, 2048 }
   0x3   :  { %s19_s16 = sshll.u32 %s631_s15, 4  ;;  %p560_p0 = scmp.ne.s32.totalorder %s711_s1, %s559_s19  ;;  %s20_s16 = int_to_ptr.vmem [resolvable:$true] %s19_s16 }
   0x4   :  { %p563_p1 = scmp.lt.u32.totalorder %s559_s19, %s711_s1 }
   0x6   :  { %p565_p2 = pnand %p563_p1, %p560_p0 }
   0x8   :  { %568 = shalt.err (!%p565_p2)
}
   0x9   :  { %s569_s24 = scalar_lea.vmem %s20_s16, 2048  ;;  %p574_p4 = scmp.lt.s32.totalorder %s20_s16, %s20_s16 }
   0xa   :  { %p570_p3 = scmp.ne.s32.totalorder %s20_s16, %s569_s24  ;;  %p575_p5 = scmp.lt.s32.totalorder %s569_s24, %s569_s24 }
   0xc   :  { %p576_p6 = por %p575_p5, %p574_p4 }
   0xe   :  { %p577_p7 = pnand %p576_p6, %p570_p3 }
  0x10   :  { %580 = shalt.err (!%p577_p7)
}
  0x11   :  { %s632_s25 = smov 64   ;;  %s633_s26 = smov 4  }
  0x12   :  { %25 = dma.hbm_to_vmem [thread:$0]  %s711_s1, 2048, %s20_s16, [#allocation3], %s632_s25, %s632_s25, %s633_s26  }
  0x13   :  { %s634_s29 = smov [#allocation5]   ;;  %s581_s7 = scalar_lea.hbm %s713_s3, 2048 }
  0x14   :  { %s33_s30 = sshll.u32 %s634_s29, 4  ;;  %p582_p8 = scmp.ne.s32.totalorder %s713_s3, %s581_s7  ;;  %s34_s30 = int_to_ptr.vmem [resolvable:$true] %s33_s30 }
  0x15   :  { %p585_p9 = scmp.lt.u32.totalorder %s581_s7, %s713_s3 }
  0x17   :  { %p587_p10 = pnand %p585_p9, %p582_p8 }
  0x19   :  { %590 = shalt.err (!%p587_p10)
}
  0x1a   :  { %s591_s12 = scalar_lea.vmem %s34_s30, 2048  ;;  %p596_p12 = scmp.lt.s32.totalorder %s34_s30, %s34_s30 }
  0x1b   :  { %p592_p11 = scmp.ne.s32.totalorder %s34_s30, %s591_s12  ;;  %p597_p13 = scmp.lt.s32.totalorder %s591_s12, %s591_s12 }
  0x1d   :  { %p598_p0 = por %p597_p13, %p596_p12 }
  0x1f   :  { %p599_p1 = pnand %p598_p0, %p592_p11 }
  0x21   :  { %602 = shalt.err (!%p599_p1)
}
  0x22   :  { %39 = dma.hbm_to_vmem [thread:$0]  %s713_s3, 2048, %s34_s30, [#allocation6], %s632_s25, %s632_s25, %s633_s26  }
  0x23   :  { %625 = dma.done.wait [#allocation3], 2048  }
  0x24   :  { %626 = vsyncadd [#allocation3], 4294965248 }
  0x25   :  { %627 = dma.done.wait [#allocation6], 2048  }
  0x26   :  { %628 = vsyncadd [#allocation6], 4294965248  ;;  %v635_v0 = vmov 0   ;;  %v47_v1 = vld [vmem:[%s710_s0] sm:$0xff]  ;;  %v48_v2 = vld [vmem:[%s710_s0 + $0x8] sm:$0xff]  ;;  %v49_v33 = vlaneseq  ;;  %s637_s18 = smov [#allocation7]  }
  0x27   :  { %526 = vset.pattern.permute.xlu0 %v635_v0  ;;  %v527_v3 = vld [vmem:[#allocation2 + $0x40] sm:$0xff]   ;;  %v529_v5 = vld [vmem:[#allocation2 + $0x48] sm:$0xff]   ;;  %v531_v7 = vld [vmem:[#allocation2 + $0x50] sm:$0xff]   ;;  %v636_v38 = vmov 1.0|1.0   ;;  %s424_s19 = sshll.u32 %s637_s18, 4  ;;  %s425_s19 = int_to_ptr.vmem [resolvable:$true] %s424_s19 }
  0x28   :  { %53 = vperm.xlu0 %526, %v47_v1   ;;  %v528_v4 = vld [vmem:[#allocation2] sm:$0xff]   ;;  %477 = vmatprep.subr.bf16.mxu0 %v527_v3  ;;  %v530_v6 = vld [vmem:[#allocation2 + $0x8] sm:$0xff]   ;;  %v532_v8 = vld [vmem:[#allocation2 + $0x10] sm:$0xff]   ;;  %v50_v34 = vand.u32 127, %v49_v33  ;;  %p608_p3 = scmp.lt.s32.totalorder %s425_s19, %s425_s19 }
  0x29   :  { %478 = vmatpush3.bf16.msra.mxu0 %v528_v4  ;;  %v533_v9 = vld [vmem:[#allocation2 + $0x58] sm:$0xff]   ;;  %v535_v11 = vld [vmem:[#allocation2 + $0x60] sm:$0xff]   ;;  %v537_v13 = vld [vmem:[#allocation2 + $0x68] sm:$0xff]  }
  0x2a   :  { %479 = vmatprep.subr.bf16.mxu0 %v529_v5  ;;  %v534_v10 = vld [vmem:[#allocation2 + $0x18] sm:$0xff]   ;;  %v536_v12 = vld [vmem:[#allocation2 + $0x20] sm:$0xff]   ;;  %v545_v16 = vld [vmem:[#allocation5 + $0x48] sm:$0xff]   ;;  %v51_v36 = vadd.s32 128, %v50_v34 }
  0x2b   :  { %v543_v14 = vld [vmem:[#allocation5 + $0x40] sm:$0xff]   ;;  %v538_v17 = vld [vmem:[#allocation2 + $0x28] sm:$0xff]   ;;  %v539_v18 = vld [vmem:[#allocation2 + $0x70] sm:$0xff]  }
  0x2c   :  { %56 = vperm.xlu0 %526, %v48_v2   ;;  %499 = vmatprep.subr.bf16.mxu1 %v543_v14  ;;  %v544_v15 = vld [vmem:[#allocation5] sm:$0xff]   ;;  %v540_v19 = vld [vmem:[#allocation2 + $0x30] sm:$0xff]   ;;  %v541_v20 = vld [vmem:[#allocation2 + $0x78] sm:$0xff]  }
  0x2d   :  { %480 = vmatpush3.bf16.msra.mxu0 %v530_v6  ;;  %500 = vmatpush3.bf16.xpose.msra.mxu1 %v544_v15  ;;  %v546_v21 = vld [vmem:[#allocation5 + $0x8] sm:$0xff]   ;;  %v547_v22 = vld [vmem:[#allocation5 + $0x50] sm:$0xff]   ;;  %v542_v23 = vld [vmem:[#allocation2 + $0x38] sm:$0xff]  }
  0x2e   :  { %481 = vmatprep.subr.bf16.mxu0 %v531_v7  ;;  %501 = vmatprep.subr.bf16.mxu1 %v545_v16  ;;  %v548_v24 = vld [vmem:[#allocation5 + $0x10] sm:$0xff]   ;;  %v549_v25 = vld [vmem:[#allocation5 + $0x58] sm:$0xff]   ;;  %v551_v27 = vld [vmem:[#allocation5 + $0x60] sm:$0xff]  }
  0x2f   :  { %v550_v26 = vld [vmem:[#allocation5 + $0x18] sm:$0xff]   ;;  %v552_v28 = vld [vmem:[#allocation5 + $0x20] sm:$0xff]   ;;  %v553_v29 = vld [vmem:[#allocation5 + $0x68] sm:$0xff]  }
  0x30   :  { %v554_v30 = vld [vmem:[#allocation5 + $0x28] sm:$0xff]   ;;  %v555_v31 = vld [vmem:[#allocation5 + $0x70] sm:$0xff]   ;;  %v557_v39 = vld [vmem:[#allocation5 + $0x78] sm:$0xff]  }
  0x31   :  { %482 = vmatpush3.bf16.msra.mxu0 %v532_v8  ;;  %v556_v32 = vld [vmem:[#allocation5 + $0x30] sm:$0xff]   ;;  %v558_v40 = vld [vmem:[#allocation5 + $0x38] sm:$0xff]   ;;  %v104_v41 = vld [vmem:[%s712_s2] sm:$0xf]  ;;  %s603_s2 = scalar_lea.vmem %s425_s19, 512 }
  0x32   :  { %483 = vmatprep.subr.bf16.mxu0 %v533_v9  ;;  %v105_v44 = vunpack.c.l.bf16 %v104_v41  ;;  %p604_p2 = scmp.ne.s32.totalorder %s425_s19, %s603_s2  ;;  %p609_p4 = scmp.lt.s32.totalorder %s603_s2, %s603_s2 }
  0x34   :  { %p610_p5 = por %p609_p4, %p608_p3 }
  0x35   :  { %484 = vmatpush3.bf16.msra.mxu0 %v534_v10  ;;  %502 = vmatpush3.bf16.xpose.msra.mxu1 %v546_v21 }
  0x36   :  { %485 = vmatprep.subr.bf16.mxu0 %v535_v11  ;;  %503 = vmatprep.subr.bf16.mxu1 %v547_v22  ;;  %p611_p6 = pnand %p610_p5, %p604_p2 }
  0x39   :  { %486 = vmatpush3.bf16.msra.mxu0 %v536_v12 }
  0x3a   :  { %487 = vmatprep.subr.bf16.mxu0 %v537_v13 }
  0x3d   :  { %488 = vmatpush3.bf16.msra.mxu0 %v538_v17  ;;  %504 = vmatpush3.bf16.xpose.msra.mxu1 %v548_v24 }
  0x3e   :  { %489 = vmatprep.subr.bf16.mxu0 %v539_v18  ;;  %505 = vmatprep.subr.bf16.mxu1 %v549_v25 }
  0x41   :  { %490 = vmatpush3.bf16.msra.mxu0 %v540_v19 }
  0x42   :  { %491 = vmatprep.subr.bf16.mxu0 %v541_v20 }
  0x45   :  { %492 = vmatpush3.bf16.msra.mxu0 %v542_v23  ;;  %506 = vmatpush3.bf16.xpose.msra.mxu1 %v550_v26 }
  0x46   :  { %507 = vmatprep.subr.bf16.mxu1 %v551_v27 }
  0x4d   :  { %508 = vmatpush3.bf16.xpose.msra.mxu1 %v552_v28 }
  0x4e   :  { %509 = vmatprep.subr.bf16.mxu1 %v553_v29 }
  0x55   :  { %510 = vmatpush3.bf16.xpose.msra.mxu1 %v554_v30 }
  0x56   :  { %511 = vmatprep.subr.bf16.mxu1 %v555_v31 }
  0x5d   :  { %512 = vmatpush3.bf16.xpose.msra.mxu1 %v556_v32 }
  0x5e   :  { %513 = vmatprep.subr.bf16.mxu1 %v557_v39 }
  0x65   :  { %514 = vmatpush3.bf16.xpose.msra.mxu1 %v558_v40 }
  0xa7   :  { %v54_v35 = vpop.permute.xlu0 %53 }
  0xa8   :  { %vm58_vm0 = vcmp.eq.s32.totalorder %v50_v34, %v54_v35  ;;  %vm59_vm4 = vcmp.eq.s32.totalorder %v51_v36, %v54_v35 }
  0xab   :  { %v57_v37 = vpop.permute.xlu0 %56 }
  0xac   :  { %vm60_vm1 = vcmp.eq.s32.totalorder %v50_v34, %v57_v37  ;;  %vm61_vm2 = vcmp.eq.s32.totalorder %v51_v36, %v57_v37 }
  0xad   :  { %vm459_vm3 = vmpackc.low %vm60_vm1, %vm58_vm0 }
  0xae   :  { %vm457_vm5 = vmpackc.low %vm61_vm2, %vm59_vm4 }
  0xaf   :  { %458 = vmatprep.mubr.msk.bf16.mxu0 %vm457_vm5, %v636_v38 }
  0xb0   :  { %460 = vmatmul.mubr.msk.bf16.vlgmr.msra.gmra.mrb[0].mxu0 %vm459_vm3, %v636_v38 }
 0x183   :  { %v493_v42 = vpop.f32.mrb[0].mxu0 }
 0x184   :  { %v494_v43 = vpop.f32.mrb[1].mxu0 }
 0x185   :  { %v495_v45 = vadd.f32 %v494_v43, %v493_v42  ;;  %v496_v46 = vpop.f32.mrb[2].mxu0 }
 0x186   :  { %v497_v47 = vpop.f32.mrb[3].mxu0 }
 0x187   :  { %v498_v48 = vadd.f32 %v497_v47, %v496_v46  ;;  %v237_v49 = vadd.f32 %v495_v45, %v105_v44 }
 0x189   :  { %v240_v50 = vadd.f32 %v498_v48, %v105_v44 }
 0x18b   :  { %v243_v51 = vpack.c.bf16 %v240_v50, %v237_v49 }
 0x18d   :  { %515 = vmatprep.mubr.bf16.mxu1 %v243_v51 }
 0x18e   :  { %516 = vmatmul.mubr.bf16.vlgmr.msra.gmra.mrb[0].mxu1 %v243_v51 }
 0x261   :  { %v406_v52 = vpop.f32.mrb[0].mxu1 }
 0x262   :  { %415 = vst [vmem:[#allocation7] sm:$0xff] %v406_v52  ;;  %v408_v53 = vpop.f32.mrb[1].mxu1 }
 0x263   :  { %416 = vst [vmem:[#allocation7 + $0x8] sm:$0xff] %v408_v53  ;;  %v410_v54 = vpop.f32.mrb[2].mxu1 }
 0x264   :  { %417 = vst [vmem:[#allocation7 + $0x10] sm:$0xff] %v410_v54  ;;  %v412_v55 = vpop.f32.mrb[3].mxu1 }
 0x265   :  { %418 = vst [vmem:[#allocation7 + $0x18] sm:$0xff] %v412_v55 }
 0x266   :  { %614 = shalt.err (!%p611_p6)
}
 0x267   :  { %s615_s22 = scalar_lea.hbm %s714_s4, 512 }
 0x268   :  { %p616_p7 = scmp.ne.s32.totalorder %s714_s4, %s615_s22  ;;  %p619_p8 = scmp.lt.u32.totalorder %s615_s22, %s714_s4 }
 0x26a   :  { %p621_p9 = pnand %p619_p8, %p616_p7 }
 0x26c   :  { %624 = shalt.err (!%p621_p9)
}
 0x26d   :  { %s638_s27 = smov 256   ;;  %s639_s28 = smov 16  }
 0x26e   :  { %430 = dma.vmem_to_hbm [thread:$0]  %s425_s19, 512, %s714_s4, [#allocation4], %s638_s27, %s638_s27, %s639_s28  }
 0x26f   :  { %629 = dma.done.wait [#allocation4], 512  }
 0x270   :  { %630 = vsyncadd [#allocation4], 4294966784 }
 0x271   :  { %434 = vsyncpa [#allocation3], 1 }
 0x272   :  { %435 = vsyncpa [#allocation6], 1 }
 0x273   :  { %436 = vsyncpa [#allocation4], 1 }

</bundles_post_ra>
